<compile_context>
chip_gen: v7x
topology: tpu7x:2x2x1
jax: 0.10.0
libtpu: 0.0.40
codegen_flags: <defaults>
</compile_context>

<pallas_src>
import functools

import jax
import jax.numpy as jnp
from jax.experimental import pallas as pl
from jax.experimental.pallas import tpu as pltpu


def _fusion_kernel(temperature,
                   am_ref, q_ref, kf_ref, v_ref,
                   wq_ref, bq_ref, wkt_ref, seg_ref, wv_ref, bv_ref,
                   out_ref, probs_ref):
    """grid = (batch, S-tile).

    At s-tile 0 the per-task fusion probabilities are computed into VMEM scratch;
    every s-tile then mixes the task values with those probs (VPU) and applies a
    single (tS, H) @ (H, H) value projection (MXU, bf16 operands / f32 accum).
    """
    n_tasks = v_ref.shape[0]

    @pl.when(pl.program_id(1) == 0)
    def _compute_probs():
        # attention_mask == 0 -> valid token (matches (attention_mask == 0).float()).
        # NOTE: fully-padded sentences give length == 0 -> inf/NaN, same as the
        # PyTorch reference.
        m = (am_ref[...] == 0.0).astype(jnp.float32)                           # (1, S)
        inv_len = pl.reciprocal(jnp.sum(m, axis=-1, keepdims=True),
                                approx=True)                                   # (1, 1)

        # Sentence-level pooled query and query projection.
        query_sent = jnp.dot(m, q_ref[...],
                             preferred_element_type=jnp.float32) * inv_len     # (1, H)
        query_enc = (jnp.dot(query_sent, wq_ref[...],
                             preferred_element_type=jnp.float32)
                     + bq_ref[...])                                            # (1, D)

        # score_t = (pooled_t @ Wk^T + bk) . query_enc
        #         = pooled_t . (query_enc @ Wk) + (bk . query_enc)
        # The second term is constant over tasks and drops out of the softmax.
        # wkt_ref = tile(Wk, T) along the out-dim -> u replicated once per task.
        u_tiled = jnp.dot(query_enc, wkt_ref[...],
                          preferred_element_type=jnp.float32)                  # (1, T*D)
        pooled_flat = jnp.dot(m, kf_ref[...],
                              preferred_element_type=jnp.float32) * inv_len    # (1, T*D)
        scores = jnp.dot(pooled_flat * u_tiled, seg_ref[...],
                         preferred_element_type=jnp.float32)                   # (1, T)

        # Softmax over tasks with temperature.
        s = scores * (1.0 / temperature)
        s = s - jnp.max(s, axis=-1, keepdims=True)
        e = jnp.exp(s)
        probs_ref[...] = e * pl.reciprocal(jnp.sum(e, axis=-1, keepdims=True),
                                           approx=True)                        # (1, T)

    # ---- probability-weighted mixture over tasks, then ONE value projection ----
    p = probs_ref[...]                                                         # (1, T) f32
    mixed = p[0, 0] * v_ref[0].astype(jnp.float32)                             # (tS, H)
    for t in range(1, n_tasks):
        mixed = mixed + p[0, t] * v_ref[t].astype(jnp.float32)

    out = jnp.dot(mixed.astype(jnp.bfloat16), wv_ref[...],
                  preferred_element_type=jnp.float32) + bv_ref[...]            # (tS, H)
    out_ref[...] = out.astype(out_ref.dtype)


def adapter_fusion_sent_lvl_dynamic(query, key, value, attention_mask, params,
                                    temperature=50.0):
    """Pallas implementation of AdapterFusionSentLvlDynamic.forward
    (config.adapter_fusion = {query: True, key: True, value: True, temperature: True}).

    query:  [B, S, H] float32
    key:    [B, S, n_tasks, D] float32
    value:  [B, S, n_tasks, H] float32
    attention_mask: [B, 1, 1, S] additive mask (0.0 = attend, -10000.0 = pad)
    returns [B, S, H] float32
    """
    # TODO(synk): the PyTorch module decays self.T by T/1000 per forward (floored at
    # 1.0); that Python-side module state is not reproduced here - temperature is a
    # static per-call argument.
    B, S, H = query.shape
    n_tasks, D = key.shape[2], key.shape[3]
    KD = n_tasks * D

    # ---- wrapper-side layout plumbing (handled by XLA, not the kernel) ----
    am = attention_mask.reshape(B, 1, S).astype(jnp.float32)                   # (B, 1, S)
    key_flat = key.reshape(B, S, KD).astype(jnp.float32)                       # (B, S, T*D)
    value_tm = jnp.transpose(value, (0, 2, 1, 3)).astype(jnp.bfloat16)         # (B, T, S, H)

    wq_t = params["wq"].T.astype(jnp.float32)                                  # (H, D)
    bq = params["bq"].reshape(1, D).astype(jnp.float32)
    wk_tiled = jnp.tile(params["wk"].astype(jnp.float32), (1, n_tasks))        # (D, T*D)
    seg = (jnp.arange(KD)[:, None] // D
           == jnp.arange(n_tasks)[None, :]).astype(jnp.float32)                # (T*D, T)
    wv_t = params["wv"].T.astype(jnp.bfloat16)                                 # (H, H)
    bv = params["bv"].reshape(1, H).astype(jnp.float32)

    # S-tiling of the value/output path keeps the per-step VMEM footprint bounded
    # (important for realistic shapes on v7x's 64 MiB / v5e's 16 MiB scoped VMEM).
    tS = 256 if (S > 256 and S % 256 == 0) else S
    nS = S // tS

    kernel = functools.partial(_fusion_kernel, float(temperature))

    return pl.pallas_call(
        kernel,
        out_shape=jax.ShapeDtypeStruct((B, S, H), jnp.float32),
        grid=(B, nS),
        in_specs=[
            pl.BlockSpec((None, 1, S), lambda b, s: (b, 0, 0)),                # mask
            pl.BlockSpec((None, S, H), lambda b, s: (b, 0, 0)),                # query
            pl.BlockSpec((None, S, KD), lambda b, s: (b, 0, 0)),               # key (flat, T*D)
            pl.BlockSpec((None, n_tasks, tS, H), lambda b, s: (b, 0, s, 0)),   # value (task-major bf16)
            pl.BlockSpec((H, D), lambda b, s: (0, 0)),                         # Wq^T
            pl.BlockSpec((1, D), lambda b, s: (0, 0)),                         # bq
            pl.BlockSpec((D, KD), lambda b, s: (0, 0)),                        # tile(Wk)
            pl.BlockSpec((KD, n_tasks), lambda b, s: (0, 0)),                  # per-task segment-sum
            pl.BlockSpec((H, H), lambda b, s: (0, 0)),                         # Wv^T (bf16)
            pl.BlockSpec((1, H), lambda b, s: (0, 0)),                         # bv
        ],
        out_specs=pl.BlockSpec((None, tS, H), lambda b, s: (b, s, 0)),
        scratch_shapes=[pltpu.VMEM((1, n_tasks), jnp.float32)],                # probs, carried over S-tiles
        compiler_params=pltpu.CompilerParams(
            dimension_semantics=("parallel", "arbitrary"),
            vmem_limit_bytes=48 * 1024 * 1024,
        ),
    )(am, query.astype(jnp.float32), key_flat, value_tm,
      wq_t, bq, wk_tiled, seg, wv_t, bv)


def _reference(query, key, value, attention_mask, params, temperature):
    """Pure-JAX (f32) transcription of the PyTorch forward (query/key/value branch)."""
    m = (attention_mask == 0).astype(jnp.float32).squeeze()          # (B, S)
    length = jnp.sum(m, axis=1)                                      # (B,)
    key_m = key * m[:, :, None, None]
    key_sent = jnp.sum(key_m, axis=1) / length[:, None, None]        # (B, T, D)
    q_m = query * m[:, :, None]
    query_sent = jnp.sum(q_m, axis=1) / length[:, None]              # (B, H)
    query_enc = query_sent @ params["wq"].T + params["bq"]           # (B, D)
    key_enc = key_sent @ params["wk"].T + params["bk"]               # (B, T, D)
    value_enc = value @ params["wv"].T + params["bv"]                # (B, S, T, H)
    scores = jnp.einsum("btd,bd->bt", key_enc, query_enc)
    probs = jax.nn.softmax(scores / temperature, axis=-1)            # (B, T)
    return jnp.einsum("bt,bsth->bsh", probs, value_enc)              # (B, S, H)


def _init_params(key, hidden_size, dense_size):
    """Deterministic torch.nn.Linear-style init (uniform(-1/sqrt(fan_in), ...))."""
    ks = jax.random.split(key, 6)

    def lin(kw, kb, out_f, in_f):
        bound = 1.0 / jnp.sqrt(in_f)
        w = jax.random.uniform(kw, (out_f, in_f), jnp.float32, -bound, bound)
        b = jax.random.uniform(kb, (out_f,), jnp.float32, -bound, bound)
        return w, b

    wq, bq = lin(ks[0], ks[1], dense_size, hidden_size)   # self.query: H -> D
    wk, bk = lin(ks[2], ks[3], dense_size, dense_size)    # self.key:   D -> D
    wv, bv = lin(ks[4], ks[5], hidden_size, hidden_size)  # self.value: H -> H
    return {"wq": wq, "bq": bq, "wk": wk, "bk": bk, "wv": wv, "bv": bv}


if __name__ == "__main__":
    # Small, module-consistent shapes.
    B, S = 2, 8
    hidden_size = 32
    reduction_factor = 4
    dense_size = hidden_size // reduction_factor          # 8
    n_tasks = 4
    T0 = 50.0                                             # temperature=True

    root = jax.random.PRNGKey(0)
    k_q, k_k, k_v, k_p = jax.random.split(root, 4)

    query = jax.random.normal(k_q, (B, S, hidden_size), jnp.float32)
    key = jax.random.normal(k_k, (B, S, n_tasks, dense_size), jnp.float32)
    value = jax.random.normal(k_v, (B, S, n_tasks, hidden_size), jnp.float32)

    # HF-style extended additive mask [B, 1, 1, S]: 0.0 = attend, -10000.0 = pad.
    lengths = jnp.array([S, 5], dtype=jnp.int32)
    token_valid = (jnp.arange(S)[None, :] < lengths[:, None])        # (B, S) bool
    attention_mask = jnp.where(token_valid, 0.0, -10000.0).astype(jnp.float32)
    attention_mask = attention_mask[:, None, None, :]                # (B, 1, 1, S)

    params = _init_params(k_p, hidden_size, dense_size)

    out = adapter_fusion_sent_lvl_dynamic(query, key, value, attention_mask,
                                          params, temperature=T0)
    out = jax.block_until_ready(out)

    ref = _reference(query, key, value, attention_mask, params, T0)
    ref = jax.block_until_ready(ref)

    assert out.shape == (B, S, hidden_size), out.shape
    # Tolerance loosened vs the pure-f32 version: value path runs in bf16 on the MXU.
    if not jnp.allclose(out, ref, atol=2e-2, rtol=2e-2):
        raise AssertionError("Pallas kernel does not match reference")

    print("KERNEL_OK")
</pallas_src>

<mosaic_0001>
module attributes {stable_mosaic.version = 11 : i64} {
  func.func @_fusion_kernel(%arg0: i32, %arg1: i32, %arg2: memref<1x1x8xf32, #tpu.memory_space<vmem>>, %arg3: memref<1x8x32xf32, #tpu.memory_space<vmem>>, %arg4: memref<1x8x32xf32, #tpu.memory_space<vmem>>, %arg5: memref<1x4x8x32xbf16, #tpu.memory_space<vmem>>, %arg6: memref<32x8xf32, #tpu.memory_space<vmem>>, %arg7: memref<1x8xf32, #tpu.memory_space<vmem>>, %arg8: memref<8x32xf32, #tpu.memory_space<vmem>>, %arg9: memref<32x4xf32, #tpu.memory_space<vmem>>, %arg10: memref<32x32xbf16, #tpu.memory_space<vmem>>, %arg11: memref<1x32xf32, #tpu.memory_space<vmem>>, %arg12: memref<1x8x32xf32, #tpu.memory_space<vmem>>, %arg13: memref<1x4xf32, #tpu.memory_space<vmem>>) attributes {dimension_semantics = [#tpu.dimension_semantics<parallel>, #tpu.dimension_semantics<arbitrary>], iteration_bounds = array<i64: 2, 1>, scalar_prefetch = 0 : i64, scratch_operands = 1 : i64, tpu.core_type = #tpu.core_type<tc>, window_params = [{transform_indices = @transform_0, window_bounds = array<i64: 1, 1, 8>}, {transform_indices = @transform_1, window_bounds = array<i64: 1, 8, 32>}, {transform_indices = @transform_2, window_bounds = array<i64: 1, 8, 32>}, {transform_indices = @transform_3, window_bounds = array<i64: 1, 4, 8, 32>}, {pipeline_mode = #tpu.pipeline_mode<synchronous>, transform_indices = @transform_4, window_bounds = array<i64: 32, 8>}, {pipeline_mode = #tpu.pipeline_mode<synchronous>, transform_indices = @transform_5, window_bounds = array<i64: 1, 8>}, {pipeline_mode = #tpu.pipeline_mode<synchronous>, transform_indices = @transform_6, window_bounds = array<i64: 8, 32>}, {pipeline_mode = #tpu.pipeline_mode<synchronous>, transform_indices = @transform_7, window_bounds = array<i64: 32, 4>}, {pipeline_mode = #tpu.pipeline_mode<synchronous>, transform_indices = @transform_8, window_bounds = array<i64: 32, 32>}, {pipeline_mode = #tpu.pipeline_mode<synchronous>, transform_indices = @transform_9, window_bounds = array<i64: 1, 32>}, {transform_indices = @transform_10, window_bounds = array<i64: 1, 8, 32>}]} {
    %c0_i32 = arith.constant 0 : i32
    %0 = arith.cmpi eq, %arg1, %c0_i32 : i32
    %1 = arith.extui %0 : i1 to i32
    %c0_i32_0 = arith.constant 0 : i32
    %2 = arith.cmpi ne, %1, %c0_i32_0 : i32
    scf.if %2 {
      %c0_22 = arith.constant 0 : index
      %c0_23 = arith.constant 0 : index
      %c0_24 = arith.constant 0 : index
      %44 = vector.load %arg2[%c0_22, %c0_23, %c0_24] : memref<1x1x8xf32, #tpu.memory_space<vmem>>, vector<1x1x8xf32>
      %45 = vector.shape_cast %44 : vector<1x1x8xf32> to vector<1x8xf32>
      %cst_25 = arith.constant 0.000000e+00 : f32
      %46 = vector.broadcast %cst_25 : f32 to vector<1x8xf32>
      %47 = arith.cmpf oeq, %45, %46 : vector<1x8xf32>
      %48 = arith.extui %47 : vector<1x8xi1> to vector<1x8xi32>
      %49 = arith.sitofp %48 : vector<1x8xi32> to vector<1x8xf32>
      %cst_26 = arith.constant dense<0.000000e+00> : vector<1xf32>
      %50 = vector.multi_reduction <add>, %49, %cst_26 [1] : vector<1x8xf32> to vector<1xf32>
      %51 = vector.shape_cast %50 : vector<1xf32> to vector<1x1xf32>
      %52 = tpu.reciprocal %51 {approx = true} : vector<1x1xf32> -> vector<1x1xf32>
      %c0_27 = arith.constant 0 : index
      %c0_28 = arith.constant 0 : index
      %c0_29 = arith.constant 0 : index
      %53 = vector.load %arg3[%c0_27, %c0_28, %c0_29] : memref<1x8x32xf32, #tpu.memory_space<vmem>>, vector<1x8x32xf32>
      %54 = vector.shape_cast %53 : vector<1x8x32xf32> to vector<8x32xf32>
      %cst_30 = arith.constant dense<0.000000e+00> : vector<1x32xf32>
      %55 = tpu.matmul %49, %54, %cst_30 {dimension_numbers = #tpu.dot_dimension_numbers<[1], [0], [0], [1], [0, 0, 1, 1], [], []>} : vector<1x8xf32>, vector<8x32xf32>, vector<1x32xf32> -> vector<1x32xf32>
      %56 = vector.broadcast %52 : vector<1x1xf32> to vector<1x32xf32>
      %57 = arith.mulf %55, %56 : vector<1x32xf32>
      %c0_31 = arith.constant 0 : index
      %c0_32 = arith.constant 0 : index
      %58 = vector.load %arg6[%c0_31, %c0_32] : memref<32x8xf32, #tpu.memory_space<vmem>>, vector<32x8xf32>
      %cst_33 = arith.constant dense<0.000000e+00> : vector<1x8xf32>
      %59 = tpu.matmul %57, %58, %cst_33 {dimension_numbers = #tpu.dot_dimension_numbers<[1], [0], [0], [1], [0, 0, 1, 1], [], []>} : vector<1x32xf32>, vector<32x8xf32>, vector<1x8xf32> -> vector<1x8xf32>
      %c0_34 = arith.constant 0 : index
      %c0_35 = arith.constant 0 : index
      %60 = vector.load %arg7[%c0_34, %c0_35] : memref<1x8xf32, #tpu.memory_space<vmem>>, vector<1x8xf32>
      %61 = arith.addf %59, %60 : vector<1x8xf32>
      %c0_36 = arith.constant 0 : index
      %c0_37 = arith.constant 0 : index
      %62 = vector.load %arg8[%c0_36, %c0_37] : memref<8x32xf32, #tpu.memory_space<vmem>>, vector<8x32xf32>
      %cst_38 = arith.constant dense<0.000000e+00> : vector<1x32xf32>
      %63 = tpu.matmul %61, %62, %cst_38 {dimension_numbers = #tpu.dot_dimension_numbers<[1], [0], [0], [1], [0, 0, 1, 1], [], []>} : vector<1x8xf32>, vector<8x32xf32>, vector<1x32xf32> -> vector<1x32xf32>
      %c0_39 = arith.constant 0 : index
      %c0_40 = arith.constant 0 : index
      %c0_41 = arith.constant 0 : index
      %64 = vector.load %arg4[%c0_39, %c0_40, %c0_41] : memref<1x8x32xf32, #tpu.memory_space<vmem>>, vector<1x8x32xf32>
      %65 = vector.shape_cast %64 : vector<1x8x32xf32> to vector<8x32xf32>
      %cst_42 = arith.constant dense<0.000000e+00> : vector<1x32xf32>
      %66 = tpu.matmul %49, %65, %cst_42 {dimension_numbers = #tpu.dot_dimension_numbers<[1], [0], [0], [1], [0, 0, 1, 1], [], []>} : vector<1x8xf32>, vector<8x32xf32>, vector<1x32xf32> -> vector<1x32xf32>
      %67 = vector.broadcast %52 : vector<1x1xf32> to vector<1x32xf32>
      %68 = arith.mulf %66, %67 : vector<1x32xf32>
      %69 = arith.mulf %68, %63 : vector<1x32xf32>
      %c0_43 = arith.constant 0 : index
      %c0_44 = arith.constant 0 : index
      %70 = vector.load %arg9[%c0_43, %c0_44] : memref<32x4xf32, #tpu.memory_space<vmem>>, vector<32x4xf32>
      %cst_45 = arith.constant dense<0.000000e+00> : vector<1x4xf32>
      %71 = tpu.matmul %69, %70, %cst_45 {dimension_numbers = #tpu.dot_dimension_numbers<[1], [0], [0], [1], [0, 0, 1, 1], [], []>} : vector<1x32xf32>, vector<32x4xf32>, vector<1x4xf32> -> vector<1x4xf32>
      %cst_46 = arith.constant 2.000000e-02 : f32
      %72 = vector.broadcast %cst_46 : f32 to vector<1x4xf32>
      %73 = arith.mulf %71, %72 : vector<1x4xf32>
      %cst_47 = arith.constant dense<0xFF800000> : vector<1xf32>
      %74 = vector.multi_reduction <maximumf>, %73, %cst_47 [1] : vector<1x4xf32> to vector<1xf32>
      %75 = vector.shape_cast %74 : vector<1xf32> to vector<1x1xf32>
      %76 = vector.broadcast %75 : vector<1x1xf32> to vector<1x4xf32>
      %77 = arith.subf %73, %76 : vector<1x4xf32>
      %78 = math.exp %77 : vector<1x4xf32>
      %cst_48 = arith.constant dense<0.000000e+00> : vector<1xf32>
      %79 = vector.multi_reduction <add>, %78, %cst_48 [1] : vector<1x4xf32> to vector<1xf32>
      %80 = vector.shape_cast %79 : vector<1xf32> to vector<1x1xf32>
      %81 = tpu.reciprocal %80 {approx = true} : vector<1x1xf32> -> vector<1x1xf32>
      %82 = vector.broadcast %81 : vector<1x1xf32> to vector<1x4xf32>
      %83 = arith.mulf %78, %82 : vector<1x4xf32>
      %c0_49 = arith.constant 0 : index
      %c0_50 = arith.constant 0 : index
      %84 = vector.load %arg13[%c0_49, %c0_50] : memref<1x4xf32, #tpu.memory_space<vmem>>, vector<1x4xf32>
      tpu.vector_store %arg13[%c0_49, %c0_50], %83 {strides = array<i32>} : memref<1x4xf32, #tpu.memory_space<vmem>>, vector<1x4xf32>,
    } else {
    }
    %c0 = arith.constant 0 : index
    %c0_1 = arith.constant 0 : index
    %3 = vector.load %arg13[%c0, %c0_1] : memref<1x4xf32, #tpu.memory_space<vmem>>, vector<1x4xf32>
    %4 = vector.extract_strided_slice %3 {offsets = [0, 0], sizes = [1, 1], strides = [1, 1]} : vector<1x4xf32> to vector<1x1xf32>
    %5 = vector.extract %4[0, 0] : f32 from vector<1x1xf32>
    %c0_2 = arith.constant 0 : index
    %c0_3 = arith.constant 0 : index
    %c0_4 = arith.constant 0 : index
    %c0_5 = arith.constant 0 : index
    %6 = vector.load %arg5[%c0_2, %c0_3, %c0_4, %c0_5] : memref<1x4x8x32xbf16, #tpu.memory_space<vmem>>, vector<1x1x8x32xbf16>
    %7 = vector.shape_cast %6 : vector<1x1x8x32xbf16> to vector<8x32xbf16>
    %8 = arith.extf %7 : vector<8x32xbf16> to vector<8x32xf32>
    %9 = vector.broadcast %5 : f32 to vector<8x32xf32>
    %10 = arith.mulf %9, %8 : vector<8x32xf32>
    %11 = vector.extract_strided_slice %3 {offsets = [0, 1], sizes = [1, 1], strides = [1, 1]} : vector<1x4xf32> to vector<1x1xf32>
    %12 = vector.extract %11[0, 0] : f32 from vector<1x1xf32>
    %c0_6 = arith.constant 0 : index
    %c1 = arith.constant 1 : index
    %c0_7 = arith.constant 0 : index
    %c0_8 = arith.constant 0 : index
    %13 = vector.load %arg5[%c0_6, %c1, %c0_7, %c0_8] : memref<1x4x8x32xbf16, #tpu.memory_space<vmem>>, vector<1x1x8x32xbf16>
    %14 = vector.shape_cast %13 : vector<1x1x8x32xbf16> to vector<8x32xbf16>
    %15 = arith.extf %14 : vector<8x32xbf16> to vector<8x32xf32>
    %16 = vector.broadcast %12 : f32 to vector<8x32xf32>
    %17 = arith.mulf %16, %15 : vector<8x32xf32>
    %18 = arith.addf %10, %17 : vector<8x32xf32>
    %19 = vector.extract_strided_slice %3 {offsets = [0, 2], sizes = [1, 1], strides = [1, 1]} : vector<1x4xf32> to vector<1x1xf32>
    %20 = vector.extract %19[0, 0] : f32 from vector<1x1xf32>
    %c0_9 = arith.constant 0 : index
    %c2 = arith.constant 2 : index
    %c0_10 = arith.constant 0 : index
    %c0_11 = arith.constant 0 : index
    %21 = vector.load %arg5[%c0_9, %c2, %c0_10, %c0_11] : memref<1x4x8x32xbf16, #tpu.memory_space<vmem>>, vector<1x1x8x32xbf16>
    %22 = vector.shape_cast %21 : vector<1x1x8x32xbf16> to vector<8x32xbf16>
    %23 = arith.extf %22 : vector<8x32xbf16> to vector<8x32xf32>
    %24 = vector.broadcast %20 : f32 to vector<8x32xf32>
    %25 = arith.mulf %24, %23 : vector<8x32xf32>
    %26 = arith.addf %18, %25 : vector<8x32xf32>
    %27 = vector.extract_strided_slice %3 {offsets = [0, 3], sizes = [1, 1], strides = [1, 1]} : vector<1x4xf32> to vector<1x1xf32>
    %28 = vector.extract %27[0, 0] : f32 from vector<1x1xf32>
    %c0_12 = arith.constant 0 : index
    %c3 = arith.constant 3 : index
    %c0_13 = arith.constant 0 : index
    %c0_14 = arith.constant 0 : index
    %29 = vector.load %arg5[%c0_12, %c3, %c0_13, %c0_14] : memref<1x4x8x32xbf16, #tpu.memory_space<vmem>>, vector<1x1x8x32xbf16>
    %30 = vector.shape_cast %29 : vector<1x1x8x32xbf16> to vector<8x32xbf16>
    %31 = arith.extf %30 : vector<8x32xbf16> to vector<8x32xf32>
    %32 = vector.broadcast %28 : f32 to vector<8x32xf32>
    %33 = arith.mulf %32, %31 : vector<8x32xf32>
    %34 = arith.addf %26, %33 : vector<8x32xf32>
    %35 = arith.truncf %34 : vector<8x32xf32> to vector<8x32xbf16>
    %c0_15 = arith.constant 0 : index
    %c0_16 = arith.constant 0 : index
    %36 = vector.load %arg10[%c0_15, %c0_16] : memref<32x32xbf16, #tpu.memory_space<vmem>>, vector<32x32xbf16>
    %cst = arith.constant dense<0.000000e+00> : vector<8x32xf32>
    %37 = tpu.matmul %35, %36, %cst {dimension_numbers = #tpu.dot_dimension_numbers<[1], [0], [0], [1], [0, 0, 1, 1], [], []>} : vector<8x32xbf16>, vector<32x32xbf16>, vector<8x32xf32> -> vector<8x32xf32>
    %c0_17 = arith.constant 0 : index
    %c0_18 = arith.constant 0 : index
    %38 = vector.load %arg11[%c0_17, %c0_18] : memref<1x32xf32, #tpu.memory_space<vmem>>, vector<1x32xf32>
    %39 = vector.broadcast %38 : vector<1x32xf32> to vector<8x32xf32>
    %40 = arith.addf %37, %39 : vector<8x32xf32>
    %c0_19 = arith.constant 0 : index
    %c0_20 = arith.constant 0 : index
    %c0_21 = arith.constant 0 : index
    %41 = vector.load %arg12[%c0_19, %c0_20, %c0_21] : memref<1x8x32xf32, #tpu.memory_space<vmem>>, vector<1x8x32xf32>
    %42 = vector.shape_cast %41 : vector<1x8x32xf32> to vector<8x32xf32>
    %43 = vector.shape_cast %40 : vector<8x32xf32> to vector<1x8x32xf32>
    tpu.vector_store %arg12[%c0_19, %c0_20, %c0_21], %43 {strides = array<i32>} : memref<1x8x32xf32, #tpu.memory_space<vmem>>, vector<1x8x32xf32>,
    return
  }
  func.func @transform_0(%arg0: i32, %arg1: i32) -> (i32, i32, i32) {
    %c0_i32 = arith.constant 0 : i32
    %c0_i32_0 = arith.constant 0 : i32
    %c0_i32_1 = arith.constant 0 : i32
    return %arg0, %c0_i32, %c0_i32_0 : i32, i32, i32
  }
  func.func @transform_1(%arg0: i32, %arg1: i32) -> (i32, i32, i32) {
    %c0_i32 = arith.constant 0 : i32
    %c0_i32_0 = arith.constant 0 : i32
    %c0_i32_1 = arith.constant 0 : i32
    return %arg0, %c0_i32, %c0_i32_0 : i32, i32, i32
  }
  func.func @transform_2(%arg0: i32, %arg1: i32) -> (i32, i32, i32) {
    %c0_i32 = arith.constant 0 : i32
    %c0_i32_0 = arith.constant 0 : i32
    %c0_i32_1 = arith.constant 0 : i32
    return %arg0, %c0_i32, %c0_i32_0 : i32, i32, i32
  }
  func.func @transform_3(%arg0: i32, %arg1: i32) -> (i32, i32, i32, i32) {
    %c0_i32 = arith.constant 0 : i32
    %c0_i32_0 = arith.constant 0 : i32
    %c0_i32_1 = arith.constant 0 : i32
    return %arg0, %c0_i32, %arg1, %c0_i32_0 : i32, i32, i32, i32
  }
  func.func @transform_4(%arg0: i32, %arg1: i32) -> (i32, i32) {
    %c0_i32 = arith.constant 0 : i32
    %c0_i32_0 = arith.constant 0 : i32
    %c0_i32_1 = arith.constant 0 : i32
    return %c0_i32, %c0_i32_0 : i32, i32
  }
  func.func @transform_5(%arg0: i32, %arg1: i32) -> (i32, i32) {
    %c0_i32 = arith.constant 0 : i32
    %c0_i32_0 = arith.constant 0 : i32
    %c0_i32_1 = arith.constant 0 : i32
    return %c0_i32, %c0_i32_0 : i32, i32
  }
  func.func @transform_6(%arg0: i32, %arg1: i32) -> (i32, i32) {
    %c0_i32 = arith.constant 0 : i32
    %c0_i32_0 = arith.constant 0 : i32
    %c0_i32_1 = arith.constant 0 : i32
    return %c0_i32, %c0_i32_0 : i32, i32
  }
  func.func @transform_7(%arg0: i32, %arg1: i32) -> (i32, i32) {
    %c0_i32 = arith.constant 0 : i32
    %c0_i32_0 = arith.constant 0 : i32
    %c0_i32_1 = arith.constant 0 : i32
    return %c0_i32, %c0_i32_0 : i32, i32
  }
  func.func @transform_8(%arg0: i32, %arg1: i32) -> (i32, i32) {
    %c0_i32 = arith.constant 0 : i32
    %c0_i32_0 = arith.constant 0 : i32
    %c0_i32_1 = arith.constant 0 : i32
    return %c0_i32, %c0_i32_0 : i32, i32
  }
  func.func @transform_9(%arg0: i32, %arg1: i32) -> (i32, i32) {
    %c0_i32 = arith.constant 0 : i32
    %c0_i32_0 = arith.constant 0 : i32
    %c0_i32_1 = arith.constant 0 : i32
    return %c0_i32, %c0_i32_0 : i32, i32
  }
  func.func @transform_10(%arg0: i32, %arg1: i32) -> (i32, i32, i32) {
    %c0_i32 = arith.constant 0 : i32
    %c0_i32_0 = arith.constant 0 : i32
    return %arg0, %arg1, %c0_i32 : i32, i32, i32
  }
}

</mosaic_0001>

<bundles_post_ra>
// kernel: tpu_custom_call.1
= control target key start
LH: loop header
LB: loop body
LE: loop exit
PB: predicated region body
PF: predicated region fallthrough
CT: control target
= control target key end

     0   :  { %15 = vsyncpa [#allocation4], 0  ;;  %s1688_s0 = inlined_call_operand.vmem [shape: f32[2,1,8], index: 0, kind: input, shape index: {}]   ;;  %s1689_s1 = inlined_call_operand.vmem [shape: f32[2,8,32], index: 1, kind: input, shape index: {}]   ;;  %s1690_s2 = inlined_call_operand.vmem [shape: f32[2,8,32], index: 2, kind: input, shape index: {}]   ;;  %s1691_s3 = inlined_call_operand.vmem [shape: bf16[2,4,8,32], index: 3, kind: input, shape index: {}]   ;;  %s1692_s4 = inlined_call_operand.vmem [shape: f32[32,8], index: 4, kind: input, shape index: {}]   ;;  %s1693_s5 = inlined_call_operand.hbm [shape: f32[1,8], index: 5, kind: input, shape index: {}]   ;;  %s1694_s6 = inlined_call_operand.vmem [shape: f32[8,32], index: 6, kind: input, shape index: {}]   ;;  %s1695_s7 = inlined_call_operand.vmem [shape: f32[32,4], index: 7, kind: input, shape index: {}]   ;;  %s1696_s8 = inlined_call_operand.vmem [shape: bf16[32,32], index: 8, kind: input, shape index: {}]   ;;  %s1697_s9 = inlined_call_operand.vmem [shape: f32[1,32], index: 9, kind: input, shape index: {}]   ;;  %s1698_s10 = inlined_call_operand.hbm [shape: f32[2,8,32], index: 10, kind: output, shape index: {}]  }
   0x1   :  { %16 = vsyncpa [#allocation5], 0 }
   0x2   :  { %18 = vsyncpa [#allocation5 + $0x1], 0  ;;  %s1456_s13 = smov 0   ;;  %s1458_s14 = smov 0  }
   0x3   :  { %s1460_s15 = smov 0   ;;  %s1462_s16 = smov 0  }
   0x4   :  { %s1464_s17 = smov 0   ;;  %s1466_s18 = smov 0  }
   0x5 LB: > { %1705 = sst [smem:[#allocation9_spill]] %s1387_s17  ;;  %s1087_s19 = sadd.s32 4294967295, %s1391_s18   ;;  %s1391_s18 = sphi %s1466_s18, %s24_s18   ;;  %s1387_s17 = sphi %s1464_s17, %s1717_s17   ;;  %s1383_s16 = sphi %s1462_s16, %s1716_s16   ;;  %s1379_s15 = sphi %s1460_s15, %s1720_s15   ;;  %s1375_s14 = sphi %s1458_s14, %s1719_s14   ;;  %s1371_s13 = sphi %s1456_s13, %s1718_s13  }
   0x6   : > { %s1088_s20 = sadd.s32 4294967294, %s1391_s18   ;;  %s36_s21 = sadd.s32 1, %s1387_s17 }
   0x7   : > { %s277_s22 = sadd.s32 1, %s1379_s15  ;;  %p38_p0 = scmp.ge.s32.totalorder %s36_s21, 2 }
   0x8   : > { %p287_p1 = scmp.ne.s32.totalorder %s1379_s15, %s1375_s14  ;;  %p288_p2 = scmp.eq.s32.totalorder %s1087_s19, 1 }
   0x9   : > { %p293_p3 = scmp.ne.s32.totalorder %s1375_s14, %s1371_s13  ;;  %s1722_s21 = smov (%p38_p0, %s36_s21), 0 }
   0xa   : > { %1706 = sst [smem:[#allocation10_spill]] %s1722_s21  ;;  %p1496_p4 = por %p288_p2, %p287_p1 }
   0xb   : > { %p294_p5 = scmp.eq.s32.totalorder %s1088_s20, 1  ;;  %s272_s24 = ssub.s32 %s1387_s17, %s1722_s21 }
   0xc   : > { %s1707_s23 = scalar_select %p1496_p4, 1, 0 }
   0xd   : > { %p1089_p6 = scmp.ge.s32.totalorder %s1391_s18, 1  ;;  %p275_p7 = scmp.eq.s32.totalorder %s272_s24, 0 }
   0xe   : > { %p1503_p8 = por %p294_p5, %p293_p3  ;;  %p301_p9 = scmp.lt.s32.totalorder %s1391_s18, 3 }
   0xf   : > { %s1509_s26 = scalar_select %p275_p7, %s1379_s15, %s277_s22  }
  0x10   : > { %s1708_s25 = scalar_select %p1503_p8, 1, 0 }
  0x11   : > { %p1511_p10 = pnand %p1089_p6, %p301_p9  ;;  %p1515_p11 = scmp.eq.s32.totalorder %s1087_s19, 0 }
  0x12   : > { %s1393_s29 = smov [#allocation3]   ;;  %s1281_s22 = scalar_lea.hbm %s1693_s5, 16 }
  0x13   : > { %s1709_s27 = scalar_select %p1511_p10, 1, 0 }
  0x14   : > { %s1710_s28 = scalar_select %p1515_p11, 1, 0 }
  0x15   : > { %p1207_p12 = pneg %p1511_p10  ;;  %s317_s30 = sshll.u32 %s1393_s29, 4  ;;  %s318_s30 = int_to_ptr.vmem [resolvable:$true] %s317_s30 }
  0x16   : > { %p1282_p0 = scmp.ne.s32.totalorder %s1693_s5, %s1281_s22  ;;  %p1288_p5 = scmp.lt.u32.totalorder %s1281_s22, %s1693_s5 }
  0x17   : > { %p1523_p13 = pnand %p1515_p11, %p1207_p12 }
  0x19   : > { %p1283_p1 = pneg %p1523_p13 }
  0x1b   : > { %p1284_p2 = pnand %p1283_p1, %p1282_p0 }
  0x1d   : > { %p1285_p3 = pneg %p1284_p2 }
  0x1f   : > { %p1290_p6 = pnand %p1288_p5, %p1285_p3 }
  0x21   : > { %1293 = shalt.err (!%p1290_p6)
}
  0x22   : > { %s1294_s17 = scalar_lea.vmem %s318_s30, 16  ;;  %s1301_s12 = scalar_lea.vmem %s318_s30, 32 }
  0x23   : > { %p1295_p7 = scmp.ne.s32.totalorder %s318_s30, %s1294_s17  ;;  %p1302_p8 = scmp.lt.s32.totalorder %s318_s30, %s318_s30 }
  0x24   : > { %p1303_p4 = scmp.lt.s32.totalorder %s1301_s12, %s1294_s17 }
  0x25   : > { %p1297_p9 = pnand %p1295_p7, %p1283_p1 }
  0x26   : > { %p1304_p11 = por %p1303_p4, %p1302_p8 }
  0x27   : > { %p1298_p12 = pneg %p1297_p9 }
  0x29   : > { %p1305_p10 = pnand %p1304_p11, %p1298_p12 }
  0x2b   : > { %1308 = shalt.err (!%p1305_p10)
}
  0x2c   : > { %1210 = dma.hbm_to_vmem [thread:$0]  (!%p1523_p13), %s1693_s5, 16, %s318_s30, [#allocation4]  }
  0x2d   : > { %p1712_p0 = scmp.ne.s32.totalorder %s1709_s27, 0 }
  0x2e   : > { %p1713_p2 = scmp.ne.s32.totalorder (!%p1712_p0), %s1710_s28, 0 }
  0x2f   : > { %373 = sbr.rel (%p1712_p0) target bundleno = 1651 (0x673), region = 60 }
  0x36   : > { %1362 = dma.done.wait (%p1713_p2), [#allocation4], 16  }
  0x37   : > { %1364 = vsyncadd (%p1713_p2), [#allocation4], 4294967280  ;;  %p425_p4 = scmp.lt.s32.totalorder %s1383_s16, 1  ;;  %v1394_v0 = vmov 0.0   ;;  %vm1395_vm0 = vmmov 0   ;;  %vm459_vm1 = vcmask 64512  }
  0x38   : > { %1136 = vmatprep.subr.mxu1 %v1394_v0  ;;  %1138 = vmatprep.mubr.msk.f32.mxu1 %vm1395_vm0, %v1394_v0  ;;  %vm453_vm2 = vcmask 57344   ;;  %v534_v5 = vld [vmem:[%s1692_s4] sm:$0xff]  ;;  %v535_v6 = vld [vmem:[%s1692_s4 + $0x8] sm:$0xff]  ;;  %v1396_v7 = vmov 0.0|0.0   ;;  %v536_v9 = vld [vmem:[%s1692_s4 + $0x10] sm:$0xff]  ;;  %vm539_vm4 = vcmask 261120  }
  0x39   : > { %s1554_s17 = scalar_select %p425_p4, %s1383_s16, 1  ;;  %1152 = vmatprep.subr.mxu0 %v1394_v0  ;;  %1154 = vmatprep.mubr.msk.f32.mxu0 %vm1395_vm0, %v1394_v0  ;;  %v1182_v8 = vpack.c.bf16 %v535_v6, %v534_v5  ;;  %v537_v10 = vld [vmem:[%s1692_s4 + $0x18] sm:$0xff]  ;;  %v613_v17 = vld [vmem:[%s1694_s6] sm:$0xff]  ;;  %v761_v24 = vld [vmem:[%s1695_s7 + $0x8] sm:$0xff]  ;;  %vm838_vm5 = vcmask 24576  }
  0x3a   : > { %v1185_v11 = vpack.c.bf16 %v537_v10, %v536_v9  ;;  %1153 = vmatpush3.msra.mxu0 %v613_v17  ;;  %v538_v18 = vld [vmem:[#allocation3] sm:$0x1]  ;;  %v762_v26 = vld [vmem:[%s1695_s7 + $0x10] sm:$0xff]  ;;  %v763_v27 = vld [vmem:[%s1695_s7 + $0x18] sm:$0xff]  ;;  %s1397_s29 = smov 126   ;;  %s1398_s12 = smov 127  }
  0x3b   : > { %s1095_s21 = sshll.u32 %s1554_s17, 3  ;;  %s427_s30 = scalar_lea.vmem %s1688_s0, %s1554_s17  ;;  %1157 = vmatprep.subr.mxu0 %v1394_v0  ;;  %v760_v23 = vld [vmem:[%s1695_s7] sm:$0xff]  ;;  %v1191_v28 = vpack.c.bf16 %v763_v27, %v762_v26  ;;  %v1274_v49 = vld [vmem:[%s1696_s8 + $0x8] sm:$0xff]  }
  0x3c   : > { %s431_s24 = scalar_lea.vmem %s1689_s1, %s1095_s21  ;;  %v449_v2 = vld [vmem:[%s427_s30] sm:$0x1]  ;;  %s435_s20 = scalar_lea.vmem %s1690_s2, %s1095_s21  ;;  %v1188_v25 = vpack.c.bf16 %v761_v24, %v760_v23 }
  0x3d   : > { %v458_v1 = vld [vmem:[%s431_s24] sm:$0xff]  ;;  %vm450_vm3 = vcmp.eq.f32.partialorder %v449_v2, 0.0  ;;  %s1116_s30 = sshll.u32 %s1554_s17, 4  ;;  %s422_s19 = sand.u32 1, %s1375_s14  }
  0x3e   : > { %1137 = vmatpush3.msra.mxu1 %v458_v1  ;;  %v1099_v3 = vsel %vm450_vm3, 1.0, %v1394_v0  ;;  %v687_v22 = vld [vmem:[%s435_s20] sm:$0xff]  ;;  %s1399_s20 = smov 125   ;;  %s443_s24 = scalar_lea.vmem %s1691_s3, %s1116_s30 }
  0x3f   : > { %1139 = vmatmul.mubr.msk.f32.vlgmr.msra.gmra.mrb[0].mxu1 %vm459_vm1, %v1099_v3  ;;  %v454_v4 = vsel %vm453_vm2, %v1099_v3, 0.0  ;;  %1181 = vmatprep.subr.bf16.mxu1 %v1396_v7  ;;  %v1273_v48 = vld [vmem:[%s1696_s8] sm:$0xff]   ;;  %v1106_v55 = vld [vmem:[%s443_s24 + $0x8] sm:$0xf]  ;;  %v1107_v59 = vld [vmem:[%s443_s24 + $0xc] sm:$0xf] }
  0x40   : > { %455 = vadd.xlane.f32.xlu0 %v454_v4  ;;  %1149 = vmatprep.mubr.msk.f32.mxu1 %vm1395_vm0, %v1394_v0  ;;  %v853_v53 = vld [vmem:[%s443_s24] sm:$0xf]  ;;  %v1105_v54 = vld [vmem:[%s443_s24 + $0x4] sm:$0xf]  ;;  %v871_v60 = vunpack.c.l.bf16 %v1106_v55  ;;  %v880_v1 = vunpack.c.l.bf16 %v1107_v59  ;;  %s1094_s21 = sshll.u32 %s422_s19, 3  ;;  %s1113_s30 = sshll.u32 %s1383_s16, 7 }
  0x41   : > { %1183 = vmatpush3.bf16.msra.mxu1 %v1182_v8  ;;  %v854_v56 = vunpack.c.l.bf16 %v853_v53  ;;  %v862_v57 = vunpack.c.l.bf16 %v1105_v54  ;;  %v1108_v9 = vld [vmem:[%s1697_s9] ss:$0 sm:$0xff]  ;;  %s424_s11 = scalar_lea.vmem [#allocation6], %s1094_s21  ;;  %s954_s16 = scalar_lea.sflag [#allocation5], %s422_s19 }
  0x42   : > { %1184 = vmatprep.subr.bf16.mxu1 %v1396_v7  ;;  %s968_s22 = sshll.u32 %s424_s11, 4  ;;  %p1714_p10 = scmp.ne.s32.totalorder %s1707_s23, 0  ;;  %s1642_s22 = int_to_ptr.vmem [resolvable:$true] %s968_s22 }
  0x45   : > { %1186 = vmatpush3.bf16.msra.mxu1 %v1185_v11 }
  0x46   : > { %1187 = vmatprep.subr.bf16.mxu1 %v1396_v7 }
  0xcd   : > { %v456_v12 = vpop.xlane.xlu0 %455 }
  0xce   : > { %1275 = vrcp.f32 %v456_v12 }
  0xd8   : > { %v1276_v13 = vpop.eup %1275 }
 0x112   : > { %v529_v14 = vpop.f32.mrb[0].mxu1 }
 0x113   : > { %v533_v15 = vmul.f32 %v1276_v13, %v529_v14  ;;  %v1140_v16 = vpop.f32.mrb[1].mxu1 }
 0x115   : > { %1150 = vmatmul.mubr.msk.f32.vlgmr.msra.gmra.mrb[2].mxu1 %vm539_vm4, %v533_v15 }
 0x116   : > { %1170 = vmatprep.mubr.msk.f32.mxu1 %vm1395_vm0, %v1394_v0  ;;  %1189 = vmatpush3.bf16.msra.mxu1 %v1188_v25 }
 0x117   : > { %1190 = vmatprep.subr.bf16.mxu1 %v1396_v7 }
 0x11a   : > { %1192 = vmatpush3.bf16.msra.mxu1 %v1191_v28 }
 0x1e8   : > { %v609_v19 = vpop.f32.mrb[2].mxu1 }
 0x1e9   : > { %v610_v20 = vadd.f32 %v609_v19, %v538_v18  ;;  %v1151_v21 = vpop.f32.mrb[3].mxu1 }
 0x1eb   : > { %1155 = vmatmul.mubr.msk.f32.vlgmr.msra.gmra.mrb[0].mxu0 %vm459_vm1, %v610_v20 }
 0x1ec   : > { %1158 = vmatpush3.msra.mxu0 %v687_v22  ;;  %1159 = vmatprep.mubr.msk.f32.mxu0 %vm1395_vm0, %v1394_v0 }
 0x1ed   : > { %1173 = vmatprep.subr.bf16.mxu0 %v1394_v0 }
 0x1ef   : > { %1160 = vmatmul.mubr.msk.f32.vlgmr.msra.gmra.mrb[2].mxu0 %vm459_vm1, %v1099_v3 }
 0x1f0   : > { %1177 = vmatprep.mubr.msk.bf16.mxu0 %vm1395_vm0, %v1394_v0  ;;  %1174 = vmatpush3.bf16.msra.mxu0 %v1273_v48 }
 0x1f1   : > { %1175 = vmatprep.subr.bf16.mxu0 %v1394_v0 }
 0x1f4   : > { %1176 = vmatpush3.bf16.msra.mxu0 %v1274_v49 }
 0x2be   : > { %v683_v29 = vpop.f32.mrb[0].mxu0 }
 0x2bf   : > { %v1156_v30 = vpop.f32.mrb[1].mxu0 }
 0x2c2   : > { %v754_v31 = vpop.f32.mrb[2].mxu0 }
 0x2c3   : > { %v758_v32 = vmul.f32 %v1276_v13, %v754_v31  ;;  %v1161_v33 = vpop.f32.mrb[3].mxu0 }
 0x2c5   : > { %v759_v34 = vmul.f32 %v758_v32, %v683_v29 }
 0x2c7   : > { %1171 = vmatmul.mubr.msk.f32.vlgmr.msra.gmra.mrb[4].mxu1 %vm539_vm4, %v759_v34 }
 0x39a   : > { %v833_v35 = vpop.f32.mrb[4].mxu1 }
 0x39b   : > { %v837_v36 = vmul.f32 0.02, %v833_v35  ;;  %v1172_v37 = vpop.f32.mrb[5].mxu1 }
 0x39d   : > { %v839_v38 = vsel %vm838_vm5, %v837_v36, -inf }
 0x39e   : > { %840 = vmax.xlane.f32.xlu0 %v839_v38 }
 0x42b   : > { %v841_v39 = vpop.xlane.xlu0 %840 }
 0x42c   : > { %v842_v40 = vsub.f32 %v837_v36, %v841_v39 }
 0x42e   : > { %v843_v41 = vmul.f32 1.442695, %v842_v40 }
 0x430   : > { %1277 = vpow2.f32 %v843_v41 }
 0x43a   : > { %v1278_v42 = vpop.eup %1277 }
 0x43b   : > { %v845_v43 = vsel %vm838_vm5, %v1278_v42, 0.0 }
 0x43c   : > { %846 = vadd.xlane.f32.xlu1 %v845_v43 }
 0x4c9   : > { %v847_v44 = vpop.xlane.xlu1 %846 }
 0x4ca   : > { %1279 = vrcp.f32 %v847_v44 }
 0x4d4   : > { %v1280_v45 = vpop.eup %1279 }
 0x4d5   : > { %v849_v46 = vmul.f32 %v1280_v45, %v1278_v42 }
 0x4d7   : > { %850 = vst.msk [vmem:[#allocation2] sm:$0x1] %vm838_vm5, %v849_v46 }
 0x4de   : > { %v851_v47 = vld [vmem:[#allocation2] sm:$0x1] }
 0x4df   : > { %866 = vrot.lane.b32.xlu0 %v851_v47, %s1397_s29  ;;  %857 = vrot.lane.b32.xlu1 %v851_v47, %s1398_s12  ;;  %1193 = vpush %v851_v47 }
 0x4e3   : > { %875 = vrot.lane.b32.xlu1 %v851_v47, %s1399_s20 }
 0x510   : > { %s1194_s29 = spop %1193 }
 0x511   : > { %v855_v58 = vstv %s1194_s29 }
 0x512   : > { %v856_v62 = vmul.f32 %v855_v58, %v854_v56 }
 0x551   : > { %v867_v50 = vpop.permute.xlu0 %866  ;;  %v858_v51 = vpop.permute.xlu1 %857 }
 0x552   : > { %1195 = vpush %v858_v51 }
 0x553   : > { %1197 = vpush %v867_v50 }
 0x555   : > { %v876_v52 = vpop.permute.xlu1 %875 }
 0x556   : > { %1199 = vpush %v876_v52 }
 0x583   : > { %s1196_s12 = spop %1195 }
 0x584   : > { %v863_v61 = vstv %s1196_s12  ;;  %s1198_s20 = spop %1197  ;;  %s1640_s12 = scalar_lea.hbm %s1698_s10, %s1113_s30 }
 0x585   : > { %v864_v63 = vmul.f32 %v863_v61, %v862_v57  ;;  %v872_v0 = vstv %s1198_s20  ;;  %s1309_s20 = scalar_lea.vmem %s1642_s22, 128 }
 0x586   : > { %v873_v3 = vmul.f32 %v872_v0, %v871_v60  ;;  %p1310_p8 = scmp.ne.s32.totalorder %s1642_s22, %s1309_s20 }
 0x587   : > { %v865_v2 = vadd.f32 %v864_v63, %v856_v62  ;;  %s1200_s17 = spop %1199 }
 0x588   : > { %v881_v4 = vstv %s1200_s17  ;;  %p1311_p11 = pnand %p1310_p8, %p1714_p10  ;;  %s1400_s17 = smov [#allocation6]  }
 0x589   : > { %v874_v5 = vadd.f32 %v873_v3, %v865_v2  ;;  %v882_v6 = vmul.f32 %v881_v4, %v880_v1  ;;  %s1313_s21 = sshll.u32 %s1400_s17, 4  ;;  %s1314_s21 = int_to_ptr.vmem [resolvable:$false] %s1313_s21 }
 0x58a   : > { %p1312_p13 = pneg %p1311_p11  ;;  %s1315_s27 = scalar_lea.vmem %s1314_s21, 256 }
 0x58b   : > { %v883_v7 = vadd.f32 %v882_v6, %v874_v5  ;;  %p1316_p1 = scmp.lt.s32.totalorder %s1642_s22, %s1314_s21  ;;  %p1317_p3 = scmp.lt.s32.totalorder %s1315_s27, %s1309_s20 }
 0x58d   : > { %v884_v8 = vpack.c.bf16 %v883_v7, %v883_v7  ;;  %p1318_p5 = por %p1317_p3, %p1316_p1 }
 0x58f   : > { %1178 = vmatmul.mubr.msk.bf16.vlgmr.msra.gmra.mrb[4].mxu0 %vm539_vm4, %v884_v8  ;;  %p1319_p6 = pnand %p1318_p5, %p1312_p13 }
 0x662   : > { %v946_v10 = vpop.f32.mrb[4].mxu0 }
 0x663   : > { %v947_v11 = vadd.f32 %v1108_v9, %v946_v10  ;;  %v1179_v12 = vpop.f32.mrb[5].mxu0 }
 0x664   : > { %v949_v13 = vpop.f32.mrb[6].mxu0 }
 0x665   : > { %v1180_v14 = vpop.f32.mrb[7].mxu0  ;;  %952 = vst.msk [vmem:[%s424_s11] sm:$0xff] %vm539_vm4, %v947_v11 }
 0x666   : > { %1322 = shalt.err (!%p1319_p6)
}
 0x667   : > { %s1323_s19 = scalar_lea.hbm %s1640_s12, 128  ;;  %s1327_s11 = scalar_lea.hbm %s1698_s10, 256 }
 0x668   : > { %p1324_p7 = scmp.ne.s32.totalorder %s1640_s12, %s1323_s19  ;;  %p1328_p0 = scmp.lt.u32.totalorder %s1640_s12, %s1698_s10 }
 0x669   : > { %p1329_p2 = scmp.lt.u32.totalorder %s1327_s11, %s1323_s19  ;;  %p1331_p8 = scmp.lt.u32.totalorder %s1323_s19, %s1640_s12 }
 0x66a   : > { %p1325_p9 = pnand %p1324_p7, %p1714_p10 }
 0x66b   : > { %p1330_p4 = por %p1329_p2, %p1328_p0 }
 0x66c   : > { %p1326_p12 = pneg %p1325_p9 }
 0x66d   : > { %p1332_p11 = por %p1331_p8, %p1330_p4 }
 0x66f   : > { %p1333_p13 = pnand %p1332_p11, %p1326_p12 }
 0x671   : > { %1336 = shalt.err (!%p1333_p13)
}
 0x672   : > { %1205 = dma.vmem_to_hbm [thread:$0]  (%p1714_p10), %s1642_s22, 128, %s1640_s12, %s954_s16  }
 0x673 PF: > { %p1217_p1 = scmp.ge.s32.totalorder %s1391_s18, 2  ;;  %s980_s20 = sand.u32 1, %s1371_s13  }
 0x674   : > { %p1715_p3 = scmp.ne.s32.totalorder %s1708_s25, 0  ;;  %s981_s17 = scalar_lea.sflag [#allocation5], %s980_s20 }
 0x676   : > { %p1212_p5 = pnand %p1217_p1, %p1715_p3 }
 0x678   : > { %1366 = dma.done.wait (!%p1212_p5), %s981_s17, 128  }
 0x679   : > { %1368 = vsyncadd (!%p1212_p5), %s981_s17, 4294967168  ;;  %s24_s18 = sadd.s32 1, %s1391_s18   ;;  %s1716_s16 = sld [smem:[#allocation9_spill]] }
 0x67a   : > { %p21_p6 = scmp.ge.s32.totalorder %s24_s18, 4   ;;  %s1717_s17 = sld [smem:[#allocation10_spill]] }
 0x67b   : > { %s1718_s13 = smov %s1375_s14  ;;  %s1719_s14 = smov %s1379_s15 }
 0x67c   : > { %s1720_s15 = smov %s1509_s26  ;;  %23 = sbr.rel (!%p21_p6) target bundleno = 5 (0x5), region = 116 }
 0x683   :  { %986 = vsyncpa [#allocation4], 1 }
 0x684   :  { %988 = vsyncpa [#allocation4 + $0x1], 1 }
 0x685   :  { %989 = vsyncpa [#allocation5], 1 }
 0x686   :  { %991 = vsyncpa [#allocation5 + $0x1], 1 }

</bundles_post_ra>
